<compile_context>
chip_gen: v7x
topology: tpu7x:2x2x1
jax: 0.10.0
libtpu: 0.0.40
codegen_flags: <defaults>
</compile_context>

<pallas_src>
import numpy as np
import jax
import jax.numpy as jnp
from jax.experimental import pallas as pl
from jax.experimental.pallas import tpu as pltpu


def _round_up(x, m):
    return ((x + m - 1) // m) * m


def _make_kernel(num_fields, r_pad):
    def kernel(ids_ref, offs_ref, bias_ref, ptab_ref, b1_ref, w2_ref, b2_ref,
               w3_ref, wvec_ref, out_ref):
        ids = ids_ref[...]                                           # (TB, F) int32 raw ids
        tb = ids.shape[0]
        lanes = jax.lax.broadcasted_iota(jnp.int32, (tb, r_pad), 1)
        # Multi-hot over the fused-table rows.  Field offsets make the per-field row
        # ranges disjoint, so OR of the per-field one-hots is exactly the 0/1 sum.
        hit = lanes == (ids[:, 0:1] + offs_ref[0])
        for f in range(1, num_fields):
            hit = hit | (lanes == (ids[:, f:f + 1] + offs_ref[f]))
        mh = jnp.where(hit, 1.0, 0.0).astype(jnp.bfloat16)           # (TB, R_PAD)

        # Deep path.  Layer 1 is fused with the embedding gather:
        #   P[r] = embed_table[r] @ W1_block(field(r))   (BN folded at prep time)
        h = jnp.dot(mh, ptab_ref[...], preferred_element_type=jnp.float32) + b1_ref[...]
        h = jnp.maximum(h, 0.0)
        h = jnp.dot(h.astype(jnp.bfloat16), w2_ref[...],
                    preferred_element_type=jnp.float32) + b2_ref[...]
        h = jnp.maximum(h, 0.0)                                      # (TB, H2_PAD) f32

        # Lane-dense output rows: (1, K) x (TB, K)^T -> (1, TB)
        deep = jax.lax.dot_general(w3_ref[...], h, (((1,), (1,)), ((), ())),
                                   preferred_element_type=jnp.float32)
        wide = jax.lax.dot_general(wvec_ref[...], mh, (((1,), (1,)), ((), ())),
                                   preferred_element_type=jnp.float32)
        logit = deep + wide + bias_ref[0, 0]
        out_ref[...] = (1.0 / (1.0 + jnp.exp(-logit)))[None]         # exact sigmoid

    return kernel


def wide_and_deep_forward(x_ids, params, *, tile_b=2048):
    """x_ids: int (B, num_fields) raw per-field indices. Returns float32 (B,) probabilities."""
    B, F = x_ids.shape
    r_pad, h1_pad = params["ptab"].shape
    h2_pad = params["w2"].shape[1]

    # Batch tiling: multiple of 16 (bf16 sublane packing); keep >= 2 tiles when the batch
    # allows it so the "parallel" grid axis shards across both v7x TensorCores.
    tile_b = max(16, min(_round_up(tile_b, 16), _round_up(B, 16)))
    if B > 16 and _round_up(B, tile_b) // tile_b < 2:
        tile_b = _round_up((B + 1) // 2, 16)
    b_pad = _round_up(B, tile_b)
    n_tiles = b_pad // tile_b

    ids = x_ids.astype(jnp.int32)
    if b_pad > B:
        ids = jnp.pad(ids, ((0, b_pad - B), (0, 0)))   # single alloc; only 16 B/row stream

    kernel = _make_kernel(F, r_pad)
    const = lambda shape: pl.BlockSpec(shape, lambda i: (0,) * len(shape))
    smem = pl.BlockSpec(memory_space=pltpu.MemorySpace.SMEM)

    out = pl.pallas_call(
        kernel,
        out_shape=jax.ShapeDtypeStruct((n_tiles, 1, tile_b), jnp.float32),
        grid=(n_tiles,),
        in_specs=[
            pl.BlockSpec((tile_b, F), lambda i: (i, 0)),   # raw field ids (batch-indexed)
            smem,                                          # field offsets (F,) int32
            smem,                                          # wide_bias + b3 scalar (1,1) f32
            const((r_pad, h1_pad)),                        # fused embed@W1 table (bf16, resident)
            const((1, h1_pad)),                            # b1 (BN folded)
            const((h1_pad, h2_pad)),                       # W2 (BN folded, bf16, resident)
            const((1, h2_pad)),                            # b2 (BN folded)
            const((1, h2_pad)),                            # w3 row
            const((1, r_pad)),                             # wide weight row (bf16)
        ],
        out_specs=pl.BlockSpec((1, 1, tile_b), lambda i: (i, 0, 0)),  # lane-dense output row
        compiler_params=pltpu.CompilerParams(
            dimension_semantics=("parallel",),
            vmem_limit_bytes=32 * 1024 * 1024),
    )(ids, params["offsets"], params["bias_total"], params["ptab"], params["b1"],
      params["w2"], params["b2"], params["w3"], params["wvec"])

    return out.reshape(b_pad)[:B]


def init_raw_params(key, field_dims, embed_dim, mlp_dims):
    """PyTorch-equivalent raw parameters (eval mode: BN running_mean=0, running_var=1)."""
    n_rows = int(sum(field_dims))
    F = len(field_dims)
    in_dim = embed_dim * F
    dims = (in_dim,) + tuple(mlp_dims)
    ks = jax.random.split(key, 12)
    eps = 1e-5
    return {
        "field_dims": tuple(field_dims),
        "embed_dim": embed_dim,
        "offsets": jnp.asarray(np.concatenate(([0], np.cumsum(field_dims)[:-1])), jnp.int32),
        "embed_table": 0.1 * jax.random.normal(ks[0], (n_rows, embed_dim), jnp.float32),
        "wide_table": 0.1 * jax.random.normal(ks[1], (n_rows, 1), jnp.float32),
        "wide_bias": jnp.zeros((), jnp.float32),
        "w1": 0.1 * jax.random.normal(ks[2], (dims[0], dims[1]), jnp.float32),
        "b1": 0.01 * jax.random.normal(ks[3], (1, dims[1]), jnp.float32),
        "bn1_scale": (1.0 + 0.01 * jax.random.normal(ks[4], (1, dims[1]), jnp.float32)) / jnp.sqrt(1.0 + eps),
        "bn1_shift": 0.01 * jax.random.normal(ks[5], (1, dims[1]), jnp.float32),
        "w2": 0.1 * jax.random.normal(ks[6], (dims[1], dims[2]), jnp.float32),
        "b2": 0.01 * jax.random.normal(ks[7], (1, dims[2]), jnp.float32),
        "bn2_scale": (1.0 + 0.01 * jax.random.normal(ks[8], (1, dims[2]), jnp.float32)) / jnp.sqrt(1.0 + eps),
        "bn2_shift": 0.01 * jax.random.normal(ks[9], (1, dims[2]), jnp.float32),
        "w3": 0.1 * jax.random.normal(ks[10], (dims[2], 1), jnp.float32),
        "b3": 0.01 * jax.random.normal(ks[11], (1, 1), jnp.float32),
    }


def prepare_params(raw):
    """One-time prep: fold BN + biases into weights, fuse the embedding table with the
    first Linear layer (per-field blocks), pad to lane width 128, cast matmul operands
    to bf16."""
    E = raw["embed_dim"]
    field_dims = raw["field_dims"]
    F = len(field_dims)
    R = int(sum(field_dims))
    h1 = raw["w1"].shape[1]
    h2 = raw["w2"].shape[1]
    r_pad = _round_up(R, 128)
    h1_pad = _round_up(h1, 128)
    h2_pad = _round_up(h2, 128)

    # Fold BatchNorm1d (eval):  (xW + b) * s + t  ==  x (W*s) + (b*s + t)
    w1f = raw["w1"] * raw["bn1_scale"]
    b1f = raw["b1"] * raw["bn1_scale"] + raw["bn1_shift"]
    w2f = raw["w2"] * raw["bn2_scale"]
    b2f = raw["b2"] * raw["bn2_scale"] + raw["bn2_shift"]

    # Fuse embedding gather + Linear 1: each table row belongs to exactly one field, so
    #   P[r] = embed_table[r] @ W1f[field(r)*E : (field(r)+1)*E, :]
    # and layer 1 becomes  multihot(B,R) @ P(R,h1)  inside the kernel.
    field_of_row = np.repeat(np.arange(F), field_dims)                  # (R,)
    w1_blocks = w1f.reshape(F, E, h1)                                   # (F, E, h1)
    ptab = jnp.einsum("re,reh->rh", raw["embed_table"], w1_blocks[field_of_row])  # (R, h1) f32

    def pad2(a, r, c):
        return jnp.zeros((r, c), a.dtype).at[:a.shape[0], :a.shape[1]].set(a)

    w3_row = jnp.zeros((1, h2_pad), jnp.float32).at[0, :h2].set(raw["w3"][:, 0])
    wvec = jnp.zeros((1, r_pad), jnp.float32).at[0, :R].set(raw["wide_table"][:, 0])

    return {
        "embed_dim": E,
        "num_fields": F,
        "offsets": raw["offsets"],
        "bias_total": (raw["wide_bias"] + raw["b3"][0, 0]).reshape(1, 1).astype(jnp.float32),
        "ptab": pad2(ptab, r_pad, h1_pad).astype(jnp.bfloat16),
        "b1": pad2(b1f, 1, h1_pad).astype(jnp.float32),
        "w2": pad2(w2f, h1_pad, h2_pad).astype(jnp.bfloat16),
        "b2": pad2(b2f, 1, h2_pad).astype(jnp.float32),
        "w3": w3_row,
        "wvec": wvec.astype(jnp.bfloat16),
    }


def reference_forward(x_ids, raw):
    """Pure-JAX f32 reference with the same eval-mode semantics."""
    idx = x_ids + raw["offsets"][None, :]
    emb = raw["embed_table"][idx]                                        # (B, F, E)
    wide = jnp.sum(raw["wide_table"][idx][..., 0], axis=1, keepdims=True) + raw["wide_bias"]
    h = emb.reshape(x_ids.shape[0], -1)
    h = jnp.maximum((h @ raw["w1"] + raw["b1"]) * raw["bn1_scale"] + raw["bn1_shift"], 0.0)
    h = jnp.maximum((h @ raw["w2"] + raw["b2"]) * raw["bn2_scale"] + raw["bn2_shift"], 0.0)
    logit = h @ raw["w3"] + raw["b3"] + wide
    return jax.nn.sigmoid(logit[:, 0])


if __name__ == "__main__":
    # small, module-consistent shapes
    field_dims = (10, 20, 30, 40)   # num_fields = 4, sum = 100 table rows
    embed_dim = 8
    mlp_dims = (32, 16)
    dropout = 0.2                   # eval mode -> identity
    batch = 30                      # not a tile multiple -> exercises batch padding

    key = jax.random.PRNGKey(0)
    k_params, *k_fields = jax.random.split(key, 1 + len(field_dims))
    raw = init_raw_params(k_params, field_dims, embed_dim, mlp_dims)
    params = prepare_params(raw)

    # x: Long tensor (batch, num_fields), field f in [0, field_dims[f])
    cols = [jax.random.randint(k_fields[f], (batch,), 0, field_dims[f], dtype=jnp.int32)
            for f in range(len(field_dims))]
    x = jnp.stack(cols, axis=1)     # (30, 4) int32

    fwd = jax.jit(lambda xi: wide_and_deep_forward(xi, params, tile_b=2048))
    out = jax.block_until_ready(fwd(x))
    assert out.shape == (batch,) and out.dtype == jnp.float32
    assert bool(jnp.all((out > 0.0) & (out < 1.0)))

    ref = reference_forward(x, raw)
    np.testing.assert_allclose(np.asarray(out), np.asarray(ref), atol=2e-2, rtol=0)
    print("KERNEL_OK")
</pallas_src>

<mosaic_0001>
module attributes {stable_mosaic.version = 11 : i64} {
  func.func @kernel(%arg0: i32, %arg1: memref<16x4xi32, #tpu.memory_space<vmem>>, %arg2: memref<4xi32, #tpu.memory_space<smem>>, %arg3: memref<1x1xf32, #tpu.memory_space<smem>>, %arg4: memref<128x128xbf16, #tpu.memory_space<vmem>>, %arg5: memref<1x128xf32, #tpu.memory_space<vmem>>, %arg6: memref<128x128xbf16, #tpu.memory_space<vmem>>, %arg7: memref<1x128xf32, #tpu.memory_space<vmem>>, %arg8: memref<1x128xf32, #tpu.memory_space<vmem>>, %arg9: memref<1x128xbf16, #tpu.memory_space<vmem>>, %arg10: memref<1x1x16xf32, #tpu.memory_space<vmem>>) attributes {dimension_semantics = [#tpu.dimension_semantics<parallel>], iteration_bounds = array<i64: 2>, scalar_prefetch = 0 : i64, scratch_operands = 0 : i64, tpu.core_type = #tpu.core_type<tc>, window_params = [{transform_indices = @transform_0, window_bounds = array<i64: 16, 4>}, {transform_indices = @transform_1, window_bounds = array<i64: 4>}, {transform_indices = @transform_2, window_bounds = array<i64: 1, 1>}, {pipeline_mode = #tpu.pipeline_mode<synchronous>, transform_indices = @transform_3, window_bounds = array<i64: 128, 128>}, {pipeline_mode = #tpu.pipeline_mode<synchronous>, transform_indices = @transform_4, window_bounds = array<i64: 1, 128>}, {pipeline_mode = #tpu.pipeline_mode<synchronous>, transform_indices = @transform_5, window_bounds = array<i64: 128, 128>}, {pipeline_mode = #tpu.pipeline_mode<synchronous>, transform_indices = @transform_6, window_bounds = array<i64: 1, 128>}, {pipeline_mode = #tpu.pipeline_mode<synchronous>, transform_indices = @transform_7, window_bounds = array<i64: 1, 128>}, {pipeline_mode = #tpu.pipeline_mode<synchronous>, transform_indices = @transform_8, window_bounds = array<i64: 1, 128>}, {transform_indices = @transform_9, window_bounds = array<i64: 1, 1, 16>}]} {
    %c0 = arith.constant 0 : index
    %c0_0 = arith.constant 0 : index
    %0 = vector.load %arg1[%c0, %c0_0] : memref<16x4xi32, #tpu.memory_space<vmem>>, vector<16x4xi32>
    %1 = tpu.iota {dimensions = array<i32: 1>} : vector<16x128xi32>
    %2 = vector.extract_strided_slice %0 {offsets = [0, 0], sizes = [16, 1], strides = [1, 1]} : vector<16x4xi32> to vector<16x1xi32>
    %c0_1 = arith.constant 0 : index
    %3 = memref.load %arg2[%c0_1] : memref<4xi32, #tpu.memory_space<smem>>
    %4 = vector.broadcast %3 : i32 to vector<16x1xi32>
    %5 = arith.addi %2, %4 : vector<16x1xi32>
    %6 = vector.broadcast %5 : vector<16x1xi32> to vector<16x128xi32>
    %7 = arith.cmpi eq, %1, %6 : vector<16x128xi32>
    %8 = vector.extract_strided_slice %0 {offsets = [0, 1], sizes = [16, 1], strides = [1, 1]} : vector<16x4xi32> to vector<16x1xi32>
    %c1 = arith.constant 1 : index
    %9 = memref.load %arg2[%c1] : memref<4xi32, #tpu.memory_space<smem>>
    %10 = vector.broadcast %9 : i32 to vector<16x1xi32>
    %11 = arith.addi %8, %10 : vector<16x1xi32>
    %12 = vector.broadcast %11 : vector<16x1xi32> to vector<16x128xi32>
    %13 = arith.cmpi eq, %1, %12 : vector<16x128xi32>
    %14 = arith.ori %7, %13 : vector<16x128xi1>
    %15 = vector.extract_strided_slice %0 {offsets = [0, 2], sizes = [16, 1], strides = [1, 1]} : vector<16x4xi32> to vector<16x1xi32>
    %c2 = arith.constant 2 : index
    %16 = memref.load %arg2[%c2] : memref<4xi32, #tpu.memory_space<smem>>
    %17 = vector.broadcast %16 : i32 to vector<16x1xi32>
    %18 = arith.addi %15, %17 : vector<16x1xi32>
    %19 = vector.broadcast %18 : vector<16x1xi32> to vector<16x128xi32>
    %20 = arith.cmpi eq, %1, %19 : vector<16x128xi32>
    %21 = arith.ori %14, %20 : vector<16x128xi1>
    %22 = vector.extract_strided_slice %0 {offsets = [0, 3], sizes = [16, 1], strides = [1, 1]} : vector<16x4xi32> to vector<16x1xi32>
    %c3 = arith.constant 3 : index
    %23 = memref.load %arg2[%c3] : memref<4xi32, #tpu.memory_space<smem>>
    %24 = vector.broadcast %23 : i32 to vector<16x1xi32>
    %25 = arith.addi %22, %24 : vector<16x1xi32>
    %26 = vector.broadcast %25 : vector<16x1xi32> to vector<16x128xi32>
    %27 = arith.cmpi eq, %1, %26 : vector<16x128xi32>
    %28 = arith.ori %21, %27 : vector<16x128xi1>
    %cst = arith.constant 1.000000e+00 : f32
    %cst_2 = arith.constant 0.000000e+00 : f32
    %29 = vector.broadcast %cst : f32 to vector<16x128xf32>
    %30 = vector.broadcast %cst_2 : f32 to vector<16x128xf32>
    %31 = arith.select %28, %29, %30 : vector<16x128xi1>, vector<16x128xf32>
    %32 = arith.truncf %31 : vector<16x128xf32> to vector<16x128xbf16>
    %c0_3 = arith.constant 0 : index
    %c0_4 = arith.constant 0 : index
    %33 = vector.load %arg4[%c0_3, %c0_4] : memref<128x128xbf16, #tpu.memory_space<vmem>>, vector<128x128xbf16>
    %cst_5 = arith.constant dense<0.000000e+00> : vector<16x128xf32>
    %34 = tpu.matmul %32, %33, %cst_5 {dimension_numbers = #tpu.dot_dimension_numbers<[1], [0], [0], [1], [0, 0, 1, 1], [], []>} : vector<16x128xbf16>, vector<128x128xbf16>, vector<16x128xf32> -> vector<16x128xf32>
    %c0_6 = arith.constant 0 : index
    %c0_7 = arith.constant 0 : index
    %35 = vector.load %arg5[%c0_6, %c0_7] : memref<1x128xf32, #tpu.memory_space<vmem>>, vector<1x128xf32>
    %36 = vector.broadcast %35 : vector<1x128xf32> to vector<16x128xf32>
    %37 = arith.addf %34, %36 : vector<16x128xf32>
    %cst_8 = arith.constant 0.000000e+00 : f32
    %38 = vector.broadcast %cst_8 : f32 to vector<16x128xf32>
    %39 = arith.maximumf %37, %38 : vector<16x128xf32>
    %40 = arith.truncf %39 : vector<16x128xf32> to vector<16x128xbf16>
    %c0_9 = arith.constant 0 : index
    %c0_10 = arith.constant 0 : index
    %41 = vector.load %arg6[%c0_9, %c0_10] : memref<128x128xbf16, #tpu.memory_space<vmem>>, vector<128x128xbf16>
    %cst_11 = arith.constant dense<0.000000e+00> : vector<16x128xf32>
    %42 = tpu.matmul %40, %41, %cst_11 {dimension_numbers = #tpu.dot_dimension_numbers<[1], [0], [0], [1], [0, 0, 1, 1], [], []>} : vector<16x128xbf16>, vector<128x128xbf16>, vector<16x128xf32> -> vector<16x128xf32>
    %c0_12 = arith.constant 0 : index
    %c0_13 = arith.constant 0 : index
    %43 = vector.load %arg7[%c0_12, %c0_13] : memref<1x128xf32, #tpu.memory_space<vmem>>, vector<1x128xf32>
    %44 = vector.broadcast %43 : vector<1x128xf32> to vector<16x128xf32>
    %45 = arith.addf %42, %44 : vector<16x128xf32>
    %cst_14 = arith.constant 0.000000e+00 : f32
    %46 = vector.broadcast %cst_14 : f32 to vector<16x128xf32>
    %47 = arith.maximumf %45, %46 : vector<16x128xf32>
    %c0_15 = arith.constant 0 : index
    %c0_16 = arith.constant 0 : index
    %48 = vector.load %arg8[%c0_15, %c0_16] : memref<1x128xf32, #tpu.memory_space<vmem>>, vector<1x128xf32>
    %cst_17 = arith.constant dense<0.000000e+00> : vector<1x16xf32>
    %49 = tpu.matmul %48, %47, %cst_17 {dimension_numbers = #tpu.dot_dimension_numbers<[1], [1], [0], [0], [0, 0, 1, 0], [], []>} : vector<1x128xf32>, vector<16x128xf32>, vector<1x16xf32> -> vector<1x16xf32>
    %c0_18 = arith.constant 0 : index
    %c0_19 = arith.constant 0 : index
    %50 = vector.load %arg9[%c0_18, %c0_19] : memref<1x128xbf16, #tpu.memory_space<vmem>>, vector<1x128xbf16>
    %cst_20 = arith.constant dense<0.000000e+00> : vector<1x16xf32>
    %51 = tpu.matmul %50, %32, %cst_20 {dimension_numbers = #tpu.dot_dimension_numbers<[1], [1], [0], [0], [0, 0, 1, 0], [], []>} : vector<1x128xbf16>, vector<16x128xbf16>, vector<1x16xf32> -> vector<1x16xf32>
    %52 = arith.addf %49, %51 : vector<1x16xf32>
    %c0_21 = arith.constant 0 : index
    %c0_22 = arith.constant 0 : index
    %53 = memref.load %arg3[%c0_21, %c0_22] : memref<1x1xf32, #tpu.memory_space<smem>>
    %54 = vector.broadcast %53 : f32 to vector<1x16xf32>
    %55 = arith.addf %52, %54 : vector<1x16xf32>
    %cst_23 = arith.constant 0.000000e+00 : f32
    %56 = vector.broadcast %cst_23 : f32 to vector<1x16xf32>
    %57 = arith.subf %56, %55 : vector<1x16xf32>
    %58 = math.exp %57 : vector<1x16xf32>
    %cst_24 = arith.constant 1.000000e+00 : f32
    %59 = vector.broadcast %cst_24 : f32 to vector<1x16xf32>
    %60 = arith.addf %59, %58 : vector<1x16xf32>
    %cst_25 = arith.constant 1.000000e+00 : f32
    %61 = vector.broadcast %cst_25 : f32 to vector<1x16xf32>
    %62 = arith.divf %61, %60 : vector<1x16xf32>
    %63 = vector.shape_cast %62 : vector<1x16xf32> to vector<1x1x16xf32>
    %c0_26 = arith.constant 0 : index
    %c0_27 = arith.constant 0 : index
    %c0_28 = arith.constant 0 : index
    %64 = vector.load %arg10[%c0_26, %c0_27, %c0_28] : memref<1x1x16xf32, #tpu.memory_space<vmem>>, vector<1x1x16xf32>
    tpu.vector_store %arg10[%c0_26, %c0_27, %c0_28], %63 {strides = array<i32>} : memref<1x1x16xf32, #tpu.memory_space<vmem>>, vector<1x1x16xf32>,
    return
  }
  func.func @transform_0(%arg0: i32) -> (i32, i32) {
    %c0_i32 = arith.constant 0 : i32
    %c0_i32_0 = arith.constant 0 : i32
    return %arg0, %c0_i32 : i32, i32
  }
  func.func @transform_1(%arg0: i32) -> i32 {
    %c0_i32 = arith.constant 0 : i32
    %c0_i32_0 = arith.constant 0 : i32
    return %c0_i32 : i32
  }
  func.func @transform_2(%arg0: i32) -> (i32, i32) {
    %c0_i32 = arith.constant 0 : i32
    %c0_i32_0 = arith.constant 0 : i32
    %c0_i32_1 = arith.constant 0 : i32
    return %c0_i32, %c0_i32_0 : i32, i32
  }
  func.func @transform_3(%arg0: i32) -> (i32, i32) {
    %c0_i32 = arith.constant 0 : i32
    %c0_i32_0 = arith.constant 0 : i32
    %c0_i32_1 = arith.constant 0 : i32
    return %c0_i32, %c0_i32_0 : i32, i32
  }
  func.func @transform_4(%arg0: i32) -> (i32, i32) {
    %c0_i32 = arith.constant 0 : i32
    %c0_i32_0 = arith.constant 0 : i32
    %c0_i32_1 = arith.constant 0 : i32
    return %c0_i32, %c0_i32_0 : i32, i32
  }
  func.func @transform_5(%arg0: i32) -> (i32, i32) {
    %c0_i32 = arith.constant 0 : i32
    %c0_i32_0 = arith.constant 0 : i32
    %c0_i32_1 = arith.constant 0 : i32
    return %c0_i32, %c0_i32_0 : i32, i32
  }
  func.func @transform_6(%arg0: i32) -> (i32, i32) {
    %c0_i32 = arith.constant 0 : i32
    %c0_i32_0 = arith.constant 0 : i32
    %c0_i32_1 = arith.constant 0 : i32
    return %c0_i32, %c0_i32_0 : i32, i32
  }
  func.func @transform_7(%arg0: i32) -> (i32, i32) {
    %c0_i32 = arith.constant 0 : i32
    %c0_i32_0 = arith.constant 0 : i32
    %c0_i32_1 = arith.constant 0 : i32
    return %c0_i32, %c0_i32_0 : i32, i32
  }
  func.func @transform_8(%arg0: i32) -> (i32, i32) {
    %c0_i32 = arith.constant 0 : i32
    %c0_i32_0 = arith.constant 0 : i32
    %c0_i32_1 = arith.constant 0 : i32
    return %c0_i32, %c0_i32_0 : i32, i32
  }
  func.func @transform_9(%arg0: i32) -> (i32, i32, i32) {
    %c0_i32 = arith.constant 0 : i32
    %c0_i32_0 = arith.constant 0 : i32
    %c0_i32_1 = arith.constant 0 : i32
    return %arg0, %c0_i32, %c0_i32_0 : i32, i32, i32
  }
}

</mosaic_0001>

<bundles_post_ra>
// kernel: _lambda_.1
= control target key start
LH: loop header
LB: loop body
LE: loop exit
PB: predicated region body
PF: predicated region fallthrough
CT: control target
= control target key end

     0   :  { %s1311_s0 = inlined_call_operand.vmem [shape: s32[32,4], index: 0, kind: input, shape index: {}]   ;;  %s1312_s1 = inlined_call_operand.hbm [shape: s32[4], index: 1, kind: input, shape index: {}]   ;;  %s1313_s2 = inlined_call_operand.<no memory space> [shape: f32[1,1], index: 2, kind: input, shape index: {}]   ;;  %s1314_s3 = inlined_call_operand.vmem [shape: bf16[128,128], index: 3, kind: input, shape index: {}]   ;;  %s1315_s4 = inlined_call_operand.vmem [shape: f32[1,128], index: 4, kind: input, shape index: {}]   ;;  %s1316_s5 = inlined_call_operand.vmem [shape: bf16[128,128], index: 5, kind: input, shape index: {}]   ;;  %s1317_s6 = inlined_call_operand.vmem [shape: f32[1,128], index: 6, kind: input, shape index: {}]   ;;  %s1318_s7 = inlined_call_operand.vmem [shape: f32[1,128], index: 7, kind: input, shape index: {}]   ;;  %s1319_s8 = inlined_call_operand.hbm [shape: bf16[1,128], index: 8, kind: input, shape index: {}]   ;;  %s1320_s9 = inlined_call_operand.vmem [shape: f32[2,1,16], index: 9, kind: output, shape index: {}]  }
   0x1   :  { %14 = sst [smem:[#allocation2]] %s1313_s2 }
   0x2   :  { %15 = vsyncpa [#allocation5], 0 }
   0x3   :  { %16 = vsyncpa [#allocation4], 0  ;;  %s1142_s11 = smov 0  }
   0x4 LB: > { %s1148_s12 = sadd.s32 4294967295, %s1077_s11   ;;  %p844_p0 = scmp.ge.s32.totalorder %s1077_s11, 1  ;;  %s1077_s11 = sphi %s1142_s11, %s22_s11  }
   0x5   : > { %p247_p1 = scmp.lt.s32.totalorder %s1077_s11, 3  ;;  %p1321_p3 = scmp.eq.s32.totalorder %s1148_s12, 0 }
   0x6   : > { %s1079_s13 = smov [#allocation6]   ;;  %s1022_s18 = scalar_lea.hbm %s1312_s1, 16 }
   0x7   : > { %p1152_p2 = pnand %p844_p0, %p247_p1  ;;  %s287_s14 = sshll.u32 %s1079_s13, 4  ;;  %s288_s14 = int_to_ptr.vmem [resolvable:$true] %s287_s14 }
   0x8   : > { %p1023_p6 = scmp.ne.s32.totalorder %s1312_s1, %s1022_s18  ;;  %p1029_p10 = scmp.lt.u32.totalorder %s1022_s18, %s1312_s1 }
   0x9   : > { %s1323_s2 = scalar_select %p1152_p2, 1, 0 }
   0xa   : > { %p967_p4 = pneg %p1152_p2 }
   0xc   : > { %p1161_p5 = pnand %p1321_p3, %p967_p4 }
   0xe   : > { %p1024_p7 = pneg %p1161_p5 }
  0x10   : > { %p1025_p8 = pnand %p1024_p7, %p1023_p6 }
  0x12   : > { %p1026_p9 = pneg %p1025_p8 }
  0x14   : > { %p1031_p11 = pnand %p1029_p10, %p1026_p9 }
  0x16   : > { %1034 = shalt.err (!%p1031_p11)
}
  0x17   : > { %s1080_s23 = smov [#allocation3]   ;;  %s1035_s28 = scalar_lea.hbm %s1319_s8, 16 }
  0x18   : > { %970 = dma.hbm_to_smem (!%p1161_p5), %s1312_s1, 16, %s1080_s23, [#allocation5]  }
  0x19   : > { %p1036_p12 = scmp.ne.s32.totalorder %s1319_s8, %s1035_s28  ;;  %p1042_p1 = scmp.lt.u32.totalorder %s1035_s28, %s1319_s8 }
  0x1b   : > { %p1038_p13 = pnand %p1036_p12, %p1024_p7 }
  0x1d   : > { %p1039_p0 = pneg %p1038_p13 }
  0x1f   : > { %p1044_p4 = pnand %p1042_p1, %p1039_p0 }
  0x21   : > { %1047 = shalt.err (!%p1044_p4)
}
  0x22   : > { %s1048_s16 = scalar_lea.vmem %s288_s14, 16  ;;  %s1055_s17 = scalar_lea.vmem %s288_s14, 32 }
  0x23   : > { %p1049_p6 = scmp.ne.s32.totalorder %s288_s14, %s1048_s16  ;;  %p1056_p10 = scmp.lt.s32.totalorder %s288_s14, %s288_s14 }
  0x24   : > { %p1057_p11 = scmp.lt.s32.totalorder %s1055_s17, %s1048_s16 }
  0x25   : > { %p1051_p8 = pnand %p1049_p6, %p1024_p7 }
  0x26   : > { %p1058_p3 = por %p1057_p11, %p1056_p10 }
  0x27   : > { %p1052_p9 = pneg %p1051_p8 }
  0x29   : > { %p1059_p2 = pnand %p1058_p3, %p1052_p9 }
  0x2b   : > { %1062 = shalt.err (!%p1059_p2)
}
  0x2c   : > { %973 = dma.hbm_to_vmem [thread:$0]  (!%p1161_p5), %s1319_s8, 16, %s288_s14, [#allocation4]  }
  0x2d   : > { %p1325_p12 = scmp.ne.s32.totalorder %s1323_s2, 0 }
  0x2e   : > { %p1326_p13 = scmp.eq.s32.totalorder (!%p1325_p12), %s1148_s12, 0 }
  0x2f   : > { %309 = sbr.rel (%p1325_p12) target bundleno = 909 (0x38d), region = 56 }
  0x36   : > { %1068 = dma.done.wait (%p1326_p13), [#allocation5], 16   ;;  %p1327_p7 = pmov %p1326_p13 }
  0x38   : > { %1070 = vsyncadd (%p1327_p7), [#allocation5], 4294967280  ;;  %p1328_p0 = pmov %p1327_p7 }
  0x3a   : > { %1072 = dma.done.wait (%p1328_p0), [#allocation4], 16   ;;  %p1329_p2 = pmov %p1328_p0 }
  0x3c   : > { %1074 = vsyncadd (%p1329_p2), [#allocation4], 4294967280 }
  0x3d   : > { %319 = sfence }
  0x3e   : > { %s851_s15 = sshll.u32 %s1148_s12, 1  ;;  %s853_s20 = sld [smem:[#allocation3 + $0x1]]  ;;  %v1081_v0 = vmov 1   ;;  %v1082_v1 = vmov 0   ;;  %v1002_v2 = vld [vmem:[%s1314_s3] sm:$0xff]   ;;  %v1083_v3 = vmov 0.0   ;;  %v360_v35 = vlaneseq }
  0x3f   : > { %997 = vset.pattern.permute.xlu1 %v1081_v0  ;;  %996 = vset.pattern.permute.xlu0 %v1082_v1  ;;  %p349_p3 = scmp.lt.s32.totalorder %s851_s15, 3  ;;  %s362_s2 = sld [smem:[#allocation3]]  ;;  %v1003_v4 = vld [vmem:[%s1314_s3 + $0x8] sm:$0xff]   ;;  %v1004_v9 = vld [vmem:[%s1314_s3 + $0x10] sm:$0xff]   ;;  %v1005_v12 = vld [vmem:[%s1314_s3 + $0x18] sm:$0xff]   ;;  %v1084_v20 = vmov 2  }
  0x40   : > { %s1218_s22 = sld [smem:[#allocation3 + $0x2]]  ;;  %903 = vmatprep.subr.bf16.mxu0 %v1083_v3  ;;  %923 = vmatprep.subr.bf16.mxu1 %v1083_v3  ;;  %s855_s10 = sld [smem:[#allocation3 + $0x3]]  ;;  %v1006_v18 = vld [vmem:[%s1314_s3 + $0x20] sm:$0xff]   ;;  %v1007_v23 = vld [vmem:[%s1314_s3 + $0x28] sm:$0xff]   ;;  %v1085_v24 = vmov 3   ;;  %v1008_v25 = vld [vmem:[%s1314_s3 + $0x30] sm:$0xff]  }
  0x41   : > { %s1331_s15 = smov (!%p349_p3, %s851_s15), 3  ;;  %904 = vmatpush3.bf16.msra.mxu0 %v1002_v2  ;;  %vm1086_vm0 = vmmov 0   ;;  %v1009_v26 = vld [vmem:[%s1314_s3 + $0x38] sm:$0xff]   ;;  %v1010_v27 = vld [vmem:[%s1316_s5] sm:$0xff]   ;;  %v1011_v28 = vld [vmem:[%s1316_s5 + $0x8] sm:$0xff]   ;;  %v361_v38 = vand.u32 127, %v360_v35 }
  0x42   : > { %905 = vmatprep.subr.bf16.mxu0 %v1083_v3  ;;  %s852_s25 = sshll.u32 %s1331_s15, 3  ;;  %919 = vmatprep.mubr.msk.bf16.mxu0 %vm1086_vm0, %v1083_v3  ;;  %v1012_v29 = vld [vmem:[%s1316_s5 + $0x10] sm:$0xff]   ;;  %v1013_v30 = vld [vmem:[%s1316_s5 + $0x18] sm:$0xff]   ;;  %v1014_v31 = vld [vmem:[%s1316_s5 + $0x20] sm:$0xff]   ;;  %v1087_v43 = vmov 1.0|1.0  }
  0x43   : > { %s352_s28 = scalar_lea.vmem %s1311_s0, %s852_s25  ;;  %939 = vmatprep.mubr.msk.bf16.mxu1 %vm1086_vm0, %v1083_v3  ;;  %924 = vmatpush3.bf16.msra.mxu1 %v1010_v27  ;;  %v1015_v32 = vld [vmem:[%s1316_s5 + $0x28] sm:$0xff]   ;;  %v1016_v44 = vld [vmem:[%s1316_s5 + $0x30] sm:$0xff]   ;;  %v1017_v45 = vld [vmem:[%s1316_s5 + $0x38] sm:$0xff]   ;;  %v1088_v56 = vmov 0.0|0.0   ;;  %s760_s24 = sld [smem:[#allocation2]] }
  0x44   : > { %v375_v5 = vstv %s853_s20  ;;  %v358_v6 = vld [vmem:[%s352_s28] sm:$0xff]  ;;  %v359_v7 = vld [vmem:[%s352_s28 + $0x8] sm:$0xff]  ;;  %925 = vmatprep.subr.bf16.mxu1 %v1083_v3  ;;  %p354_p5 = scmp.lt.s32.totalorder %s1148_s12, 1 }
  0x45   : > { %v363_v8 = vstv %s362_s2  ;;  %906 = vmatpush3.bf16.msra.mxu0 %v1003_v4  ;;  %v376_v10 = vadd.s32 %v375_v5, %v358_v6  ;;  %v377_v13 = vadd.s32 %v375_v5, %v359_v7  ;;  %v856_v46 = vld [vmem:[%s1315_s4] ss:$0 sm:$0xff] }
  0x46   : > { %v364_v11 = vadd.s32 %v363_v8, %v358_v6  ;;  %907 = vmatprep.subr.bf16.mxu0 %v1083_v3  ;;  %v365_v14 = vadd.s32 %v363_v8, %v359_v7  ;;  %v389_v15 = vstv %s1218_s22  ;;  %v403_v19 = vstv %s855_s10  ;;  %v649_v57 = vld [vmem:[#allocation6] sm:$0x1]  ;;  %s1333_s12 = smov (!%p354_p5, %s1148_s12), 1 }
  0x47   : > { %379 = vperm.xlu1 %997, %v376_v10   ;;  %v391_v16 = vadd.s32 %v389_v15, %v359_v7  ;;  %v390_v17 = vadd.s32 %v389_v15, %v358_v6  ;;  %v404_v21 = vadd.s32 %v403_v19, %v358_v6  ;;  %v405_v22 = vadd.s32 %v403_v19, %v359_v7  ;;  %v867_v58 = vld [vmem:[%s1317_s6] ss:$0 sm:$0xff]  ;;  %s356_s27 = scalar_lea.vmem %s1320_s9, %s1333_s12 }
  0x48   : > { %367 = vperm.xlu0 %996, %v364_v11   ;;  %926 = vmatpush3.bf16.msra.mxu1 %v1011_v28 }
  0x49   : > { %908 = vmatpush3.bf16.msra.mxu0 %v1004_v9  ;;  %927 = vmatprep.subr.bf16.mxu1 %v1083_v3  ;;  %v761_v10 = vstv %s760_s24 }
  0x4a   : > { %909 = vmatprep.subr.bf16.mxu0 %v1083_v3 }
  0x4b   : > { %382 = vperm.xlu1 %997, %v377_v13  }
  0x4c   : > { %370 = vperm.xlu0 %996, %v365_v14   ;;  %928 = vmatpush3.bf16.msra.mxu1 %v1012_v29 }
  0x4d   : > { %910 = vmatpush3.bf16.msra.mxu0 %v1005_v12  ;;  %929 = vmatprep.subr.bf16.mxu1 %v1083_v3 }
  0x4e   : > { %911 = vmatprep.subr.bf16.mxu0 %v1083_v3 }
  0x4f   : > { %999 = vset.pattern.permute.xlu1 %v1084_v20 }
  0x50   : > { %998 = vset.pattern.permute.xlu0 %v1084_v20  ;;  %396 = vperm.xlu1 %999, %v391_v16  }
  0x51   : > { %393 = vperm.xlu0 %998, %v390_v17   ;;  %912 = vmatpush3.bf16.msra.mxu0 %v1006_v18 }
  0x52   : > { %913 = vmatprep.subr.bf16.mxu0 %v1083_v3  ;;  %930 = vmatpush3.bf16.msra.mxu1 %v1013_v30 }
  0x53   : > { %931 = vmatprep.subr.bf16.mxu1 %v1083_v3 }
  0x54   : > { %1000 = vset.pattern.permute.xlu1 %v1085_v24 }
  0x55   : > { %1001 = vset.pattern.permute.xlu0 %v1085_v24  ;;  %407 = vperm.xlu1 %1000, %v404_v21  }
  0x56   : > { %410 = vperm.xlu0 %1001, %v405_v22   ;;  %914 = vmatpush3.bf16.msra.mxu0 %v1007_v23 }
  0x57   : > { %915 = vmatprep.subr.bf16.mxu0 %v1083_v3  ;;  %932 = vmatpush3.bf16.msra.mxu1 %v1014_v31 }
  0x58   : > { %933 = vmatprep.subr.bf16.mxu1 %v1083_v3 }
  0x5a   : > { %916 = vmatpush3.bf16.msra.mxu0 %v1008_v25 }
  0x5b   : > { %917 = vmatprep.subr.bf16.mxu0 %v1083_v3  ;;  %934 = vmatpush3.bf16.msra.mxu1 %v1015_v32 }
  0x5c   : > { %935 = vmatprep.subr.bf16.mxu1 %v1083_v3 }
  0x5e   : > { %918 = vmatpush3.bf16.msra.mxu0 %v1009_v26 }
  0x5f   : > { %943 = vmatprep.subr.bf16.mxu0 %v1083_v3  ;;  %936 = vmatpush3.bf16.msra.mxu1 %v1016_v44 }
  0x60   : > { %937 = vmatprep.subr.bf16.mxu1 %v1083_v3 }
  0x63   : > { %938 = vmatpush3.bf16.msra.mxu1 %v1017_v45 }
  0x64   : > { %956 = vmatprep.subr.bf16.mxu1 %v1088_v56 }
  0xc6   : > { %v380_v33 = vpop.permute.xlu1 %379 }
  0xc7   : > { %v368_v34 = vpop.permute.xlu0 %367  ;;  %vm384_vm1 = vcmp.eq.s32.totalorder %v361_v38, %v380_v33 }
  0xc8   : > { %vm372_vm2 = vcmp.eq.s32.totalorder %v361_v38, %v368_v34 }
  0xc9   : > { %vm386_vm6 = vmor %vm372_vm2, %vm384_vm1 }
  0xca   : > { %v383_v36 = vpop.permute.xlu1 %382 }
  0xcb   : > { %v371_v37 = vpop.permute.xlu0 %370  ;;  %vm385_vm3 = vcmp.eq.s32.totalorder %v361_v38, %v383_v36 }
  0xcc   : > { %vm373_vm4 = vcmp.eq.s32.totalorder %v361_v38, %v371_v37 }
  0xcd   : > { %vm387_vm8 = vmor %vm373_vm4, %vm385_vm3 }
  0xcf   : > { %v397_v39 = vpop.permute.xlu1 %396 }
  0xd0   : > { %v394_v40 = vpop.permute.xlu0 %393  ;;  %vm399_vm5 = vcmp.eq.s32.totalorder %v361_v38, %v397_v39 }
  0xd1   : > { %vm398_vm7 = vcmp.eq.s32.totalorder %v361_v38, %v394_v40  ;;  %vm401_vm9 = vmor %vm387_vm8, %vm399_vm5 }
  0xd2   : > { %vm400_vm10 = vmor %vm386_vm6, %vm398_vm7 }
  0xd4   : > { %v408_v41 = vpop.permute.xlu1 %407 }
  0xd5   : > { %v411_v42 = vpop.permute.xlu0 %410  ;;  %vm412_vm11 = vcmp.eq.s32.totalorder %v361_v38, %v408_v41 }
  0xd6   : > { %vm413_vm12 = vcmp.eq.s32.totalorder %v361_v38, %v411_v42  ;;  %vm414_vm13 = vmor %vm400_vm10, %vm412_vm11 }
  0xd7   : > { %vm415_vm14 = vmor %vm401_vm9, %vm413_vm12 }
  0xd8   : > { %vm865_vm15 = vmpackc.low %vm415_vm14, %vm414_vm13 }
  0xd9   : > { %920 = vmatmul.mubr.msk.bf16.vlgmr.msra.gmra.mrb[0].mxu0 %vm865_vm15, %v1087_v43 }
  0xda   : > { %944 = vmatpush3.bf16.xpose.msk.msra.mxu0 %vm865_vm15, %v1087_v43  ;;  %945 = vmatprep.mubr.msk.bf16.mxu0 %vm1086_vm0, %v1083_v3 }
  0xe1   : > { %946 = vmatmul.mubr.bf16.vlgmr.msra.gmra.mrb[4].mxu0 %v649_v57 }
 0x1ac   : > { %v524_v47 = vpop.f32.mrb[0].mxu0 }
 0x1ad   : > { %v525_v48 = vadd.f32 %v856_v46, %v524_v47  ;;  %v921_v49 = vpop.f32.mrb[1].mxu0 }
 0x1ae   : > { %v527_v50 = vpop.f32.mrb[2].mxu0 }
 0x1af   : > { %v528_v51 = vadd.f32 %v856_v46, %v527_v50  ;;  %v922_v52 = vpop.f32.mrb[3].mxu0  ;;  %v531_v53 = vmax.f32 %v525_v48, 0.0 }
 0x1b1   : > { %v532_v54 = vmax.f32 %v528_v51, 0.0 }
 0x1b3   : > { %v533_v55 = vpack.c.bf16 %v532_v54, %v531_v53 }
 0x1b4   : > { %v684_v5 = vpop.f32.mrb[4].mxu0 }
 0x1b5   : > { %940 = vmatmul.mubr.bf16.vlgmr.msra.gmra.mrb[0].mxu1 %v533_v55  ;;  %v947_v6 = vpop.f32.mrb[5].mxu0 }
 0x1b6   : > { %953 = vmatprep.mubr.msk.f32.mxu1 %vm1086_vm0, %v1083_v3  ;;  %v648_v3 = vld [vmem:[%s1318_s7] sm:$0x1]  ;;  %v687_v7 = vpop.f32.mrb[6].mxu0  ;;  %vm769_vm0 = vcmask 122880  }
 0x1b7   : > { %v948_v8 = vpop.f32.mrb[7].mxu0 }
 0x288   : > { %v639_v59 = vpop.f32.mrb[0].mxu1 }
 0x289   : > { %v640_v60 = vadd.f32 %v867_v58, %v639_v59  ;;  %v941_v61 = vpop.f32.mrb[1].mxu1 }
 0x28a   : > { %v642_v62 = vpop.f32.mrb[2].mxu1 }
 0x28b   : > { %v643_v63 = vadd.f32 %v867_v58, %v642_v62  ;;  %v942_v0 = vpop.f32.mrb[3].mxu1  ;;  %v646_v1 = vmax.f32 %v640_v60, 0.0 }
 0x28d   : > { %v647_v2 = vmax.f32 %v643_v63, 0.0 }
 0x28f   : > { %v957_v4 = vpack.c.bf16 %v647_v2, %v646_v1 }
 0x291   : > { %958 = vmatpush3.bf16.xpose.msra.mxu1 %v957_v4 }
 0x298   : > { %954 = vmatmul.mubr.f32.vlgmr.msra.gmra.mrb[4].mxu1 %v648_v3 }
 0x36b   : > { %v756_v9 = vpop.f32.mrb[4].mxu1 }
 0x36c   : > { %v757_v11 = vadd.f32 %v756_v9, %v684_v5  ;;  %v955_v12 = vpop.f32.mrb[5].mxu1 }
 0x36e   : > { %v762_v13 = vadd.f32 %v761_v10, %v757_v11 }
 0x370   : > { %v763_v14 = vsub.f32 0.0, %v762_v13 }
 0x372   : > { %v764_v15 = vmul.f32 1.442695, %v763_v14 }
 0x374   : > { %1018 = vpow2.f32 %v764_v15 }
 0x37e   : > { %v1019_v16 = vpop.eup %1018 }
 0x37f   : > { %v766_v17 = vadd.f32 1.0, %v1019_v16 }
 0x381   : > { %1020 = vrcp.f32 %v766_v17 }
 0x38b   : > { %v1021_v18 = vpop.eup %1020 }
 0x38c   : > { %770 = vst.msk [vmem:[%s356_s27] sm:$0x1] %vm769_vm0, %v1021_v18 }
 0x38d PF: > { %s22_s11 = sadd.s32 1, %s1077_s11  }
 0x38e   : > { %p19_p1 = scmp.ge.s32.totalorder %s22_s11, 4  }
 0x390   :  { %21 = sbr.rel (!%p19_p1) target bundleno = 4 (0x4), region = 96 }
 0x397   :  { %788 = vsyncpa [#allocation4], 1 }
 0x398   :  { %790 = vsyncpa [#allocation4 + $0x1], 1 }
 0x399   :  { %791 = vsyncpa [#allocation5], 1 }
 0x39a   :  { %793 = vsyncpa [#allocation5 + $0x1], 1 }

</bundles_post_ra>
